<compile_context>
chip_gen: v7x
topology: tpu7x:2x2x1
jax: 0.10.0
libtpu: 0.0.40
codegen_flags: <defaults>
</compile_context>

<pallas_src>
import functools
import math

import jax
import jax.numpy as jnp
from jax.experimental import pallas as pl
from jax.experimental.pallas import tpu as pltpu


def _sortino_partials_kernel(out_ref, y_ref, sel_ref, part_ref, acc_ref,
                             *, tile_rows: int, group: int):
    t = pl.program_id(1)
    acc_rows = acc_ref.shape[1]

    @pl.when(t == 0)
    def _init():
        acc_ref[...] = jnp.zeros_like(acc_ref)

    o = out_ref[0].astype(jnp.float32)          # (tile_rows, group*A)
    w = y_ref[0].astype(jnp.float32)
    prod = o * w                                # lane-dense elementwise (VPU)

    # Per-time-step returns: grouped lane reduction as a block-diagonal
    # selector matmul on the MXU (selector hoisted to wrapper, resident).
    r = jnp.dot(prod, sel_ref[...],
                preferred_element_type=jnp.float32)  # (tile_rows, group)

    negmask = r <= 0.0
    neg = negmask.astype(jnp.float32)
    rm = jnp.where(negmask, r, 0.0)              # masked return, computed once

    def fold(x):
        # Reduce the row (sublane) axis down to acc_rows rows with pure VALU
        # vreg adds; cross-lane / scalar reductions are deferred to the last
        # grid step so they are paid once per batch, not per step.
        if acc_rows == 8:
            return jnp.sum(x.reshape(tile_rows // 8, 8, group), axis=0)
        return jnp.sum(x, axis=0, keepdims=True)

    acc_ref[0] += fold(r)            # sum of returns
    acc_ref[1] += fold(neg)          # count of non-positive returns
    acc_ref[2] += fold(rm)           # sum of masked returns
    acc_ref[3] += fold(rm * rm)      # sum of squared masked returns

    @pl.when(t == pl.num_programs(1) - 1)
    def _finalize():
        sum_r = jnp.sum(acc_ref[0])
        cnt = jnp.sum(acc_ref[1])
        s1 = jnp.sum(acc_ref[2])
        s2 = jnp.sum(acc_ref[3])
        lane = jax.lax.broadcasted_iota(jnp.int32, (1, 1, 128), 2)
        packed = jnp.where(lane == 0, sum_r,
                 jnp.where(lane == 1, cnt,
                 jnp.where(lane == 2, s1,
                 jnp.where(lane == 3, s2, 0.0))))
        part_ref[...] = packed


def _vmem_capacity_bytes() -> int:
    try:
        info = pltpu.get_tpu_info()
        cap = int(getattr(info, "vmem_capacity_bytes", 0))
        if cap > 0:
            return cap
    except Exception:
        pass
    return 64 * 1024 * 1024  # conservative default (v7x-sized VMEM)


def sortino_loss(out: jax.Array, y: jax.Array, *, unbiased: bool = False) -> jax.Array:
    """Pallas TPU implementation of SortinoLoss.forward (returns a scalar)."""
    assert out.shape == y.shape and out.ndim == 3, "expected (B, T, A) inputs"
    B, T, A = out.shape
    itemsize = jnp.dtype(out.dtype).itemsize

    # ---- lane packing: fold `group` consecutive time steps into the lanes --
    group = math.lcm(A, 128) // A
    if group * A > 2048:                  # awkward A: keep row width modest
        group = max(1, 1024 // A)
    lane_w = group * A
    padded_lane = ((lane_w + 127) // 128) * 128

    # ---- generation-aware VMEM budget ------------------------------------
    vmem_cap = _vmem_capacity_bytes()
    if vmem_cap >= 96 * 1024 * 1024:      # v5e / v6e (128 MiB physical VMEM)
        vmem_limit = 64 * 1024 * 1024
        pipeline_budget = 48 * 1024 * 1024
    else:                                 # v7x (64 MiB physical VMEM)
        vmem_limit = 56 * 1024 * 1024
        pipeline_budget = 40 * 1024 * 1024
    # 2 inputs x 2 pipeline buffers (+ selector, accumulator, output slack).
    per_buffer_budget = min(6 * 1024 * 1024, pipeline_budget // 5)

    # ---- row tiling (pad with zeros when divisibility fails; padded rows
    #      give r == 0 and are subtracted from the downside count below) ----
    rows_needed = -(-T // group)
    # Megacore coverage: if B is odd (incl. B == 1) split the row axis into 2
    # "virtual batches" so the parallel grid axis has an even extent on v7x.
    n_split = 2 if (B % 2 == 1 and rows_needed >= 2) else 1
    rows_per_split_needed = -(-rows_needed // n_split)

    cap_rows = max(8, (per_buffer_budget // (padded_lane * itemsize)) // 8 * 8)
    if rows_per_split_needed <= cap_rows:
        tile_rows = rows_per_split_needed
        row_tiles = 1
    else:
        tile_rows = cap_rows
        row_tiles = -(-rows_per_split_needed // tile_rows)
    rows_per_split = tile_rows * row_tiles
    T_pad = n_split * rows_per_split * group

    if T_pad > T:
        pad = T_pad - T
        out = jnp.pad(out, ((0, 0), (0, pad), (0, 0)))
        y = jnp.pad(y, ((0, 0), (0, pad), (0, 0)))

    out3 = out.reshape(B * n_split, rows_per_split, lane_w)   # free reshapes
    y3 = y.reshape(B * n_split, rows_per_split, lane_w)

    # Hoisted block-diagonal selector (lane_w x group), DMA'd once and kept
    # resident via a constant index_map.
    row_id = jax.lax.broadcasted_iota(jnp.int32, (lane_w, group), 0)
    col_id = jax.lax.broadcasted_iota(jnp.int32, (lane_w, group), 1)
    sel = (row_id // A == col_id).astype(jnp.float32)

    acc_rows = 8 if tile_rows % 8 == 0 else 1

    kernel = functools.partial(_sortino_partials_kernel,
                               tile_rows=tile_rows, group=group)

    in_spec = pl.BlockSpec((1, tile_rows, lane_w), lambda b, t: (b, t, 0))
    sel_spec = pl.BlockSpec((lane_w, group), lambda b, t: (0, 0))
    part_spec = pl.BlockSpec((1, 1, 128), lambda b, t: (b, 0, 0))

    parts = pl.pallas_call(
        kernel,
        out_shape=jax.ShapeDtypeStruct((B * n_split, 1, 128), jnp.float32),
        grid_spec=pltpu.PrefetchScalarGridSpec(
            num_scalar_prefetch=0,
            grid=(B * n_split, row_tiles),
            in_specs=[in_spec, in_spec, sel_spec],
            out_specs=part_spec,
            scratch_shapes=[pltpu.VMEM((4, acc_rows, group), jnp.float32)],
        ),
        compiler_params=pltpu.CompilerParams(
            dimension_semantics=("parallel", "arbitrary"),
            vmem_limit_bytes=vmem_limit,
        ),
        cost_estimate=pl.CostEstimate(
            flops=2 * B * T_pad * A,
            transcendentals=0,
            bytes_accessed=2 * B * T_pad * A * itemsize + B * n_split * 128 * 4,
        ),
    )(out3, y3, sel)

    # ---- final combine: a handful of scalar ops in plain JAX --------------
    parts = parts.reshape(B, n_split, 128)
    sum_r = jnp.sum(parts[..., 0], axis=1)                       # (B,)
    cnt = jnp.sum(parts[..., 1]) - jnp.float32(B * (T_pad - T))  # pad fix
    s1 = jnp.sum(parts[..., 2])
    s2 = jnp.sum(parts[..., 3])

    mean_b = sum_r / T
    denom = cnt - 1.0 if unbiased else cnt
    # Single-pass variance; clamp tiny negatives from f32 cancellation.
    var = jnp.maximum(s2 - s1 * s1 / cnt, 0.0) / denom
    downside_risk = jnp.sqrt(var)
    # NOTE: cnt == 0 (no non-positive returns) yields NaN/Inf, matching
    # torch.std of an empty tensor in the reference module.
    return -jnp.mean(mean_b / downside_risk)


def _reference(out, y, *, unbiased=False):
    # Pure-JAX reference mirroring the PyTorch forward.
    returns = jnp.sum(out * y, axis=2)
    mean = jnp.mean(returns, axis=1)
    masked = returns[returns <= 0]
    downside = jnp.std(masked, ddof=1 if unbiased else 0)
    return -jnp.mean(mean / downside)


if __name__ == "__main__":
    key = jax.random.PRNGKey(0)
    k1, k2 = jax.random.split(key)
    B, T, A = 2, 8, 16  # batch, time steps, assets
    out = jax.random.normal(k1, (B, T, A), dtype=jnp.float32)        # weights
    y = jax.random.normal(k2, (B, T, A), dtype=jnp.float32) * 0.02   # returns

    loss = sortino_loss(out, y, unbiased=False)
    jax.block_until_ready(loss)

    ref = _reference(out, y, unbiased=False)
    assert jnp.allclose(loss, ref, rtol=1e-4, atol=1e-6), (loss, ref)

    print("KERNEL_OK")
</pallas_src>

<mosaic_0001>
module attributes {stable_mosaic.version = 11 : i64} {
  func.func @_sortino_partials_kernel(%arg0: i32, %arg1: i32, %arg2: memref<1x1x128xf32, #tpu.memory_space<vmem>>, %arg3: memref<1x1x128xf32, #tpu.memory_space<vmem>>, %arg4: memref<128x8xf32, #tpu.memory_space<vmem>>, %arg5: memref<1x1x128xf32, #tpu.memory_space<vmem>>, %arg6: memref<4x1x8xf32, #tpu.memory_space<vmem>>) attributes {dimension_semantics = [#tpu.dimension_semantics<parallel>, #tpu.dimension_semantics<arbitrary>], iteration_bounds = array<i64: 2, 1>, scalar_prefetch = 0 : i64, scratch_operands = 1 : i64, tpu.core_type = #tpu.core_type<tc>, window_params = [{transform_indices = @transform_0, window_bounds = array<i64: 1, 1, 128>}, {transform_indices = @transform_1, window_bounds = array<i64: 1, 1, 128>}, {pipeline_mode = #tpu.pipeline_mode<synchronous>, transform_indices = @transform_2, window_bounds = array<i64: 128, 8>}, {transform_indices = @transform_3, window_bounds = array<i64: 1, 1, 128>}]} {
    %c0_i32 = arith.constant 0 : i32
    %0 = arith.cmpi eq, %arg1, %c0_i32 : i32
    %1 = arith.extui %0 : i1 to i32
    %c0_i32_0 = arith.constant 0 : i32
    %2 = arith.cmpi ne, %1, %c0_i32_0 : i32
    scf.if %2 {
      %cst_37 = arith.constant 0.000000e+00 : f32
      %52 = vector.broadcast %cst_37 : f32 to vector<4x1x8xf32>
      %c0_38 = arith.constant 0 : index
      %c0_39 = arith.constant 0 : index
      %c0_40 = arith.constant 0 : index
      %53 = vector.load %arg6[%c0_38, %c0_39, %c0_40] : memref<4x1x8xf32, #tpu.memory_space<vmem>>, vector<4x1x8xf32>
      tpu.vector_store %arg6[%c0_38, %c0_39, %c0_40], %52 {strides = array<i32>} : memref<4x1x8xf32, #tpu.memory_space<vmem>>, vector<4x1x8xf32>,
    } else {
    }
    %c0 = arith.constant 0 : index
    %c0_1 = arith.constant 0 : index
    %c0_2 = arith.constant 0 : index
    %3 = vector.load %arg2[%c0, %c0_1, %c0_2] : memref<1x1x128xf32, #tpu.memory_space<vmem>>, vector<1x1x128xf32>
    %4 = vector.shape_cast %3 : vector<1x1x128xf32> to vector<1x128xf32>
    %c0_3 = arith.constant 0 : index
    %c0_4 = arith.constant 0 : index
    %c0_5 = arith.constant 0 : index
    %5 = vector.load %arg3[%c0_3, %c0_4, %c0_5] : memref<1x1x128xf32, #tpu.memory_space<vmem>>, vector<1x1x128xf32>
    %6 = vector.shape_cast %5 : vector<1x1x128xf32> to vector<1x128xf32>
    %7 = arith.mulf %4, %6 : vector<1x128xf32>
    %c0_6 = arith.constant 0 : index
    %c0_7 = arith.constant 0 : index
    %8 = vector.load %arg4[%c0_6, %c0_7] : memref<128x8xf32, #tpu.memory_space<vmem>>, vector<128x8xf32>
    %cst = arith.constant dense<0.000000e+00> : vector<1x8xf32>
    %9 = tpu.matmul %7, %8, %cst {dimension_numbers = #tpu.dot_dimension_numbers<[1], [0], [0], [1], [0, 0, 1, 1], [], []>} : vector<1x128xf32>, vector<128x8xf32>, vector<1x8xf32> -> vector<1x8xf32>
    %cst_8 = arith.constant 0.000000e+00 : f32
    %10 = vector.broadcast %cst_8 : f32 to vector<1x8xf32>
    %11 = arith.cmpf ole, %9, %10 : vector<1x8xf32>
    %12 = arith.extui %11 : vector<1x8xi1> to vector<1x8xi32>
    %13 = arith.sitofp %12 : vector<1x8xi32> to vector<1x8xf32>
    %cst_9 = arith.constant 0.000000e+00 : f32
    %14 = vector.broadcast %cst_9 : f32 to vector<1x8xf32>
    %15 = arith.select %11, %9, %14 : vector<1x8xi1>, vector<1x8xf32>
    %c0_10 = arith.constant 0 : index
    %c0_11 = arith.constant 0 : index
    %c0_12 = arith.constant 0 : index
    %16 = vector.load %arg6[%c0_10, %c0_11, %c0_12] : memref<4x1x8xf32, #tpu.memory_space<vmem>>, vector<1x1x8xf32>
    %17 = vector.shape_cast %16 : vector<1x1x8xf32> to vector<1x8xf32>
    %cst_13 = arith.constant dense<0.000000e+00> : vector<8xf32>
    %18 = vector.multi_reduction <add>, %9, %cst_13 [0] : vector<1x8xf32> to vector<8xf32>
    %19 = vector.shape_cast %18 : vector<8xf32> to vector<1x8xf32>
    %20 = arith.addf %17, %19 : vector<1x8xf32>
    %c0_14 = arith.constant 0 : index
    %c0_15 = arith.constant 0 : index
    %c0_16 = arith.constant 0 : index
    %21 = vector.load %arg6[%c0_14, %c0_15, %c0_16] : memref<4x1x8xf32, #tpu.memory_space<vmem>>, vector<1x1x8xf32>
    %22 = vector.shape_cast %21 : vector<1x1x8xf32> to vector<1x8xf32>
    %23 = vector.shape_cast %20 : vector<1x8xf32> to vector<1x1x8xf32>
    tpu.vector_store %arg6[%c0_14, %c0_15, %c0_16], %23 {strides = array<i32>} : memref<4x1x8xf32, #tpu.memory_space<vmem>>, vector<1x1x8xf32>,
    %c1 = arith.constant 1 : index
    %c0_17 = arith.constant 0 : index
    %c0_18 = arith.constant 0 : index
    %24 = vector.load %arg6[%c1, %c0_17, %c0_18] : memref<4x1x8xf32, #tpu.memory_space<vmem>>, vector<1x1x8xf32>
    %25 = vector.shape_cast %24 : vector<1x1x8xf32> to vector<1x8xf32>
    %cst_19 = arith.constant dense<0.000000e+00> : vector<8xf32>
    %26 = vector.multi_reduction <add>, %13, %cst_19 [0] : vector<1x8xf32> to vector<8xf32>
    %27 = vector.shape_cast %26 : vector<8xf32> to vector<1x8xf32>
    %28 = arith.addf %25, %27 : vector<1x8xf32>
    %c1_20 = arith.constant 1 : index
    %c0_21 = arith.constant 0 : index
    %c0_22 = arith.constant 0 : index
    %29 = vector.load %arg6[%c1_20, %c0_21, %c0_22] : memref<4x1x8xf32, #tpu.memory_space<vmem>>, vector<1x1x8xf32>
    %30 = vector.shape_cast %29 : vector<1x1x8xf32> to vector<1x8xf32>
    %31 = vector.shape_cast %28 : vector<1x8xf32> to vector<1x1x8xf32>
    tpu.vector_store %arg6[%c1_20, %c0_21, %c0_22], %31 {strides = array<i32>} : memref<4x1x8xf32, #tpu.memory_space<vmem>>, vector<1x1x8xf32>,
    %c2 = arith.constant 2 : index
    %c0_23 = arith.constant 0 : index
    %c0_24 = arith.constant 0 : index
    %32 = vector.load %arg6[%c2, %c0_23, %c0_24] : memref<4x1x8xf32, #tpu.memory_space<vmem>>, vector<1x1x8xf32>
    %33 = vector.shape_cast %32 : vector<1x1x8xf32> to vector<1x8xf32>
    %cst_25 = arith.constant dense<0.000000e+00> : vector<8xf32>
    %34 = vector.multi_reduction <add>, %15, %cst_25 [0] : vector<1x8xf32> to vector<8xf32>
    %35 = vector.shape_cast %34 : vector<8xf32> to vector<1x8xf32>
    %36 = arith.addf %33, %35 : vector<1x8xf32>
    %c2_26 = arith.constant 2 : index
    %c0_27 = arith.constant 0 : index
    %c0_28 = arith.constant 0 : index
    %37 = vector.load %arg6[%c2_26, %c0_27, %c0_28] : memref<4x1x8xf32, #tpu.memory_space<vmem>>, vector<1x1x8xf32>
    %38 = vector.shape_cast %37 : vector<1x1x8xf32> to vector<1x8xf32>
    %39 = vector.shape_cast %36 : vector<1x8xf32> to vector<1x1x8xf32>
    tpu.vector_store %arg6[%c2_26, %c0_27, %c0_28], %39 {strides = array<i32>} : memref<4x1x8xf32, #tpu.memory_space<vmem>>, vector<1x1x8xf32>,
    %c3 = arith.constant 3 : index
    %c0_29 = arith.constant 0 : index
    %c0_30 = arith.constant 0 : index
    %40 = vector.load %arg6[%c3, %c0_29, %c0_30] : memref<4x1x8xf32, #tpu.memory_space<vmem>>, vector<1x1x8xf32>
    %41 = vector.shape_cast %40 : vector<1x1x8xf32> to vector<1x8xf32>
    %42 = arith.mulf %15, %15 : vector<1x8xf32>
    %cst_31 = arith.constant dense<0.000000e+00> : vector<8xf32>
    %43 = vector.multi_reduction <add>, %42, %cst_31 [0] : vector<1x8xf32> to vector<8xf32>
    %44 = vector.shape_cast %43 : vector<8xf32> to vector<1x8xf32>
    %45 = arith.addf %41, %44 : vector<1x8xf32>
    %c3_32 = arith.constant 3 : index
    %c0_33 = arith.constant 0 : index
    %c0_34 = arith.constant 0 : index
    %46 = vector.load %arg6[%c3_32, %c0_33, %c0_34] : memref<4x1x8xf32, #tpu.memory_space<vmem>>, vector<1x1x8xf32>
    %47 = vector.shape_cast %46 : vector<1x1x8xf32> to vector<1x8xf32>
    %48 = vector.shape_cast %45 : vector<1x8xf32> to vector<1x1x8xf32>
    tpu.vector_store %arg6[%c3_32, %c0_33, %c0_34], %48 {strides = array<i32>} : memref<4x1x8xf32, #tpu.memory_space<vmem>>, vector<1x1x8xf32>,
    %c0_i32_35 = arith.constant 0 : i32
    %49 = arith.cmpi eq, %arg1, %c0_i32_35 : i32
    %50 = arith.extui %49 : i1 to i32
    %c0_i32_36 = arith.constant 0 : i32
    %51 = arith.cmpi ne, %50, %c0_i32_36 : i32
    scf.if %51 {
      %c0_37 = arith.constant 0 : index
      %c0_38 = arith.constant 0 : index
      %c0_39 = arith.constant 0 : index
      %52 = vector.load %arg6[%c0_37, %c0_38, %c0_39] : memref<4x1x8xf32, #tpu.memory_space<vmem>>, vector<1x1x8xf32>
      %53 = vector.shape_cast %52 : vector<1x1x8xf32> to vector<1x8xf32>
      %54 = vector.shape_cast %53 : vector<1x8xf32> to vector<1x1x8xf32>
      %cst_40 = arith.constant dense<0.000000e+00> : vector<1xf32>
      %55 = vector.multi_reduction <add>, %54, %cst_40 [1, 2] : vector<1x1x8xf32> to vector<1xf32>
      %56 = vector.shape_cast %55 : vector<1xf32> to vector<1x1x1xf32>
      %57 = vector.extract %56[0, 0, 0] : f32 from vector<1x1x1xf32>
      %c1_41 = arith.constant 1 : index
      %c0_42 = arith.constant 0 : index
      %c0_43 = arith.constant 0 : index
      %58 = vector.load %arg6[%c1_41, %c0_42, %c0_43] : memref<4x1x8xf32, #tpu.memory_space<vmem>>, vector<1x1x8xf32>
      %59 = vector.shape_cast %58 : vector<1x1x8xf32> to vector<1x8xf32>
      %60 = vector.shape_cast %59 : vector<1x8xf32> to vector<1x1x8xf32>
      %cst_44 = arith.constant dense<0.000000e+00> : vector<1xf32>
      %61 = vector.multi_reduction <add>, %60, %cst_44 [1, 2] : vector<1x1x8xf32> to vector<1xf32>
      %62 = vector.shape_cast %61 : vector<1xf32> to vector<1x1x1xf32>
      %63 = vector.extract %62[0, 0, 0] : f32 from vector<1x1x1xf32>
      %c2_45 = arith.constant 2 : index
      %c0_46 = arith.constant 0 : index
      %c0_47 = arith.constant 0 : index
      %64 = vector.load %arg6[%c2_45, %c0_46, %c0_47] : memref<4x1x8xf32, #tpu.memory_space<vmem>>, vector<1x1x8xf32>
      %65 = vector.shape_cast %64 : vector<1x1x8xf32> to vector<1x8xf32>
      %66 = vector.shape_cast %65 : vector<1x8xf32> to vector<1x1x8xf32>
      %cst_48 = arith.constant dense<0.000000e+00> : vector<1xf32>
      %67 = vector.multi_reduction <add>, %66, %cst_48 [1, 2] : vector<1x1x8xf32> to vector<1xf32>
      %68 = vector.shape_cast %67 : vector<1xf32> to vector<1x1x1xf32>
      %69 = vector.extract %68[0, 0, 0] : f32 from vector<1x1x1xf32>
      %c3_49 = arith.constant 3 : index
      %c0_50 = arith.constant 0 : index
      %c0_51 = arith.constant 0 : index
      %70 = vector.load %arg6[%c3_49, %c0_50, %c0_51] : memref<4x1x8xf32, #tpu.memory_space<vmem>>, vector<1x1x8xf32>
      %71 = vector.shape_cast %70 : vector<1x1x8xf32> to vector<1x8xf32>
      %72 = vector.shape_cast %71 : vector<1x8xf32> to vector<1x1x8xf32>
      %cst_52 = arith.constant dense<0.000000e+00> : vector<1xf32>
      %73 = vector.multi_reduction <add>, %72, %cst_52 [1, 2] : vector<1x1x8xf32> to vector<1xf32>
      %74 = vector.shape_cast %73 : vector<1xf32> to vector<1x1x1xf32>
      %75 = vector.extract %74[0, 0, 0] : f32 from vector<1x1x1xf32>
      %76 = tpu.iota {dimensions = array<i32: 2>} : vector<1x1x128xi32>
      %c0_i32_53 = arith.constant 0 : i32
      %77 = vector.broadcast %c0_i32_53 : i32 to vector<1x1x128xi32>
      %78 = arith.cmpi eq, %76, %77 : vector<1x1x128xi32>
      %c1_i32 = arith.constant 1 : i32
      %79 = vector.broadcast %c1_i32 : i32 to vector<1x1x128xi32>
      %80 = arith.cmpi eq, %76, %79 : vector<1x1x128xi32>
      %c2_i32 = arith.constant 2 : i32
      %81 = vector.broadcast %c2_i32 : i32 to vector<1x1x128xi32>
      %82 = arith.cmpi eq, %76, %81 : vector<1x1x128xi32>
      %c3_i32 = arith.constant 3 : i32
      %83 = vector.broadcast %c3_i32 : i32 to vector<1x1x128xi32>
      %84 = arith.cmpi eq, %76, %83 : vector<1x1x128xi32>
      %cst_54 = arith.constant 0.000000e+00 : f32
      %85 = vector.broadcast %75 : f32 to vector<1x1x128xf32>
      %86 = vector.broadcast %cst_54 : f32 to vector<1x1x128xf32>
      %87 = arith.select %84, %85, %86 : vector<1x1x128xi1>, vector<1x1x128xf32>
      %88 = vector.broadcast %69 : f32 to vector<1x1x128xf32>
      %89 = arith.select %82, %88, %87 : vector<1x1x128xi1>, vector<1x1x128xf32>
      %90 = vector.broadcast %63 : f32 to vector<1x1x128xf32>
      %91 = arith.select %80, %90, %89 : vector<1x1x128xi1>, vector<1x1x128xf32>
      %92 = vector.broadcast %57 : f32 to vector<1x1x128xf32>
      %93 = arith.select %78, %92, %91 : vector<1x1x128xi1>, vector<1x1x128xf32>
      %c0_55 = arith.constant 0 : index
      %c0_56 = arith.constant 0 : index
      %c0_57 = arith.constant 0 : index
      %94 = vector.load %arg5[%c0_55, %c0_56, %c0_57] : memref<1x1x128xf32, #tpu.memory_space<vmem>>, vector<1x1x128xf32>
      tpu.vector_store %arg5[%c0_55, %c0_56, %c0_57], %93 {strides = array<i32>} : memref<1x1x128xf32, #tpu.memory_space<vmem>>, vector<1x1x128xf32>,
    } else {
    }
    return
  }
  func.func @transform_0(%arg0: i32, %arg1: i32) -> (i32, i32, i32) {
    %c0_i32 = arith.constant 0 : i32
    %c0_i32_0 = arith.constant 0 : i32
    return %arg0, %arg1, %c0_i32 : i32, i32, i32
  }
  func.func @transform_1(%arg0: i32, %arg1: i32) -> (i32, i32, i32) {
    %c0_i32 = arith.constant 0 : i32
    %c0_i32_0 = arith.constant 0 : i32
    return %arg0, %arg1, %c0_i32 : i32, i32, i32
  }
  func.func @transform_2(%arg0: i32, %arg1: i32) -> (i32, i32) {
    %c0_i32 = arith.constant 0 : i32
    %c0_i32_0 = arith.constant 0 : i32
    %c0_i32_1 = arith.constant 0 : i32
    return %c0_i32, %c0_i32_0 : i32, i32
  }
  func.func @transform_3(%arg0: i32, %arg1: i32) -> (i32, i32, i32) {
    %c0_i32 = arith.constant 0 : i32
    %c0_i32_0 = arith.constant 0 : i32
    %c0_i32_1 = arith.constant 0 : i32
    return %arg0, %c0_i32, %c0_i32_0 : i32, i32, i32
  }
}

</mosaic_0001>

<bundles_post_ra>
// kernel: tpu_custom_call.1
= control target key start
LH: loop header
LB: loop body
LE: loop exit
PB: predicated region body
PF: predicated region fallthrough
CT: control target
= control target key end

     0   :  { %8 = vsyncpa [#allocation4], 0  ;;  %s913_s0 = inlined_call_operand.vmem [shape: f32[2,1,128], index: 0, kind: input, shape index: {}]   ;;  %s914_s1 = inlined_call_operand.vmem [shape: f32[2,1,128], index: 1, kind: input, shape index: {}]   ;;  %s915_s2 = inlined_call_operand.vmem [shape: f32[128,8], index: 2, kind: input, shape index: {}]   ;;  %s916_s3 = inlined_call_operand.hbm [shape: f32[2,1,128], index: 3, kind: output, shape index: {}]  }
   0x1   :  { %10 = vsyncpa [#allocation4 + $0x1], 0  ;;  %s738_s12 = smov 0   ;;  %s740_s13 = smov 0  }
   0x2   :  { %s742_s14 = smov 0   ;;  %s744_s15 = smov 0  }
   0x3   :  { %s746_s16 = smov 0   ;;  %s748_s17 = smov 0  }
   0x4 LB: > { %s483_s18 = sadd.s32 4294967295, %s712_s17   ;;  %s484_s19 = sadd.s32 4294967294, %s712_s17   ;;  %s712_s17 = sphi %s748_s17, %s16_s17   ;;  %s708_s16 = sphi %s746_s16, %s923_s16   ;;  %s704_s15 = sphi %s744_s15, %s922_s15   ;;  %s700_s14 = sphi %s742_s14, %s921_s14   ;;  %s696_s13 = sphi %s740_s13, %s920_s13   ;;  %s692_s12 = sphi %s738_s12, %s919_s12  }
   0x5   : > { %s28_s20 = sadd.s32 1, %s708_s16  ;;  %s112_s21 = sadd.s32 1, %s700_s14 }
   0x6   : > { %p30_p0 = scmp.ge.s32.totalorder %s28_s20, 2  ;;  %p122_p1 = scmp.ne.s32.totalorder %s700_s14, %s696_s13 }
   0x7   : > { %p123_p2 = scmp.eq.s32.totalorder %s483_s18, 1  ;;  %p128_p3 = scmp.ne.s32.totalorder %s696_s13, %s692_s12 }
   0x8   : > { %s925_s20 = smov (%p30_p0, %s28_s20), 0  ;;  %p129_p5 = scmp.eq.s32.totalorder %s484_s19, 1 }
   0x9   : > { %p778_p4 = por %p123_p2, %p122_p1  ;;  %s109_s23 = ssub.s32 %s708_s16, %s925_s20 }
   0xa   : > { %p487_p6 = scmp.ge.s32.totalorder %s712_s17, 1  ;;  %p110_p7 = scmp.eq.s32.totalorder %s109_s23, 0 }
   0xb   : > { %p785_p8 = por %p129_p5, %p128_p3  ;;  %p168_p9 = scmp.lt.s32.totalorder %s712_s17, 3 }
   0xc   : > { %s791_s25 = scalar_select %p110_p7, %s700_s14, %s112_s21  }
   0xd   : > { %p169_p10 = pnand %p487_p6, %p168_p9 }
   0xe   : > { %v222_v0 = vld [vmem:[%s915_s2] sm:$0xff] (!%p169_p10)  ;;  %v223_v1 = vld [vmem:[%s915_s2 + $0x8] sm:$0xff] (!%p169_p10)  ;;  %v224_v2 = vld [vmem:[%s915_s2 + $0x10] sm:$0xff] (!%p169_p10)  ;;  %v714_v3 = vmov (!%p169_p10), 0.0|0.0   ;;  %vm715_vm0 = vmmov (!%p169_p10), 0   ;;  %v716_v6 = vmov (!%p169_p10), 0.0  }
   0xf   : > { %172 = sbr.rel (%p169_p10) target bundleno = 500 (0x1f4), region = 32  ;;  %544 = vmatprep.subr.bf16.mxu0 (!%p169_p10), %v714_v3  ;;  %v545_v4 = vpack.c.bf16 (!%p169_p10), %v223_v1, %v222_v0  ;;  %v225_v5 = vld [vmem:[%s915_s2 + $0x18] sm:$0xff] (!%p169_p10)  ;;  %541 = vmatprep.mubr.msk.f32.mxu0 (!%p169_p10), %vm715_vm0, %v716_v6  ;;  %vm214_vm1 = vcmask (!%p169_p10), 57344   ;;  %v226_v8 = vld [vmem:[%s915_s2 + $0x20] sm:$0xff] (!%p169_p10)  ;;  %v227_v9 = vld [vmem:[%s915_s2 + $0x28] sm:$0xff] (!%p169_p10)  ;;  %p198_p11 = scmp.lt.s32.totalorder (!%p169_p10), %s704_s15, 1 }
  0x10   : > { %215 = vst.msk [vmem:[#allocation2] sm:$0x1] (!%p169_p10), %vm214_vm1, %v716_v6  ;;  %216 = vst.msk [vmem:[#allocation2 + $0x1] sm:$0x1] (!%p169_p10), %vm214_vm1, %v716_v6  ;;  %v548_v7 = vpack.c.bf16 (!%p169_p10), %v225_v5, %v224_v2  ;;  %v551_v10 = vpack.c.bf16 (!%p169_p10), %v227_v9, %v226_v8  ;;  %v228_v11 = vld [vmem:[%s915_s2 + $0x30] sm:$0xff] (!%p169_p10)  ;;  %v229_v12 = vld [vmem:[%s915_s2 + $0x38] sm:$0xff] (!%p169_p10) }
  0x11   : > { %217 = vst.msk [vmem:[#allocation2 + $0x2] sm:$0x1] (!%p169_p10), %vm214_vm1, %v716_v6  ;;  %218 = vst.msk [vmem:[#allocation2 + $0x3] sm:$0x1] (!%p169_p10), %vm214_vm1, %v716_v6  ;;  %546 = vmatpush3.bf16.msra.mxu0 (!%p169_p10), %v545_v4  ;;  %v554_v13 = vpack.c.bf16 (!%p169_p10), %v229_v12, %v228_v11  ;;  %v230_v14 = vld [vmem:[%s915_s2 + $0x40] sm:$0xff] (!%p169_p10)  ;;  %v231_v15 = vld [vmem:[%s915_s2 + $0x48] sm:$0xff] (!%p169_p10) }
  0x12   : > { %547 = vmatprep.subr.bf16.mxu0 (!%p169_p10), %v714_v3  ;;  %v557_v16 = vpack.c.bf16 (!%p169_p10), %v231_v15, %v230_v14  ;;  %v232_v17 = vld [vmem:[%s915_s2 + $0x50] sm:$0xff] (!%p169_p10)  ;;  %v233_v18 = vld [vmem:[%s915_s2 + $0x58] sm:$0xff] (!%p169_p10)  ;;  %v234_v20 = vld [vmem:[%s915_s2 + $0x60] sm:$0xff] (!%p169_p10)  ;;  %v380_v14 = vlaneseq (!%p169_p10)  ;;  %s196_s4 = sand.u32 (!%p169_p10), 1, %s696_s13   ;;  %s489_s9 = sshll.u32 (!%p169_p10), %s704_s15, 4 }
  0x13   : > { %v560_v19 = vpack.c.bf16 (!%p169_p10), %v233_v18, %v232_v17  ;;  %v235_v21 = vld [vmem:[%s915_s2 + $0x68] sm:$0xff] (!%p169_p10)  ;;  %v236_v23 = vld [vmem:[%s915_s2 + $0x70] sm:$0xff] (!%p169_p10)  ;;  %v237_v24 = vld [vmem:[%s915_s2 + $0x78] sm:$0xff] (!%p169_p10)  ;;  %s866_s21 = scalar_lea.hbm (!%p169_p10), %s916_s3, %s489_s9  ;;  %s717_s26 = smov (!%p169_p10), [#allocation3]  }
  0x14   : > { %v563_v22 = vpack.c.bf16 (!%p169_p10), %v235_v21, %v234_v20  ;;  %v566_v25 = vpack.c.bf16 (!%p169_p10), %v237_v24, %v236_v23  ;;  %v381_v15 = vand.u32 (!%p169_p10), 127, %v380_v14 }
  0x15   : > { %549 = vmatpush3.bf16.msra.mxu0 (!%p169_p10), %v548_v7 }
  0x16   : > { %550 = vmatprep.subr.bf16.mxu0 %v714_v3  ;;  %s199_s10 = scalar_select %p198_p11, %s704_s15, 1  ;;  %vm385_vm3 = vcmp.eq.s32.totalorder %v381_v15, 3  ;;  %vm384_vm4 = vcmp.eq.s32.totalorder %v381_v15, 2  ;;  %vm383_vm5 = vcmp.eq.s32.totalorder %v381_v15, 1  ;;  %vm382_vm6 = vcmp.eq.s32.totalorder %v381_v15, 0 }
  0x17   : > { %v312_v29 = vld [vmem:[#allocation2] sm:$0x1]  ;;  %v318_v31 = vld [vmem:[#allocation2 + $0x1] sm:$0x1]  ;;  %s396_s15 = scalar_lea.sflag [#allocation4], %s196_s4 }
  0x18   : > { %s203_s27 = scalar_lea.vmem %s913_s0, %s199_s10  ;;  %s209_s30 = scalar_lea.vmem %s914_s1, %s199_s10  ;;  %v323_v32 = vld [vmem:[#allocation2 + $0x2] sm:$0x1]  ;;  %v328_v37 = vld [vmem:[#allocation2 + $0x3] sm:$0x1] }
  0x19   : > { %552 = vmatpush3.bf16.msra.mxu0 %v551_v10  ;;  %v219_v26 = vld [vmem:[%s203_s27] sm:$0x1]  ;;  %s197_s10 = scalar_lea.vmem [#allocation3], %s196_s4  ;;  %s638_s27 = sshll.u32 %s717_s26, 4  ;;  %s639_s27 = int_to_ptr.vmem [resolvable:$false] %s638_s27 }
  0x1a   : > { %553 = vmatprep.subr.bf16.mxu0 %v714_v3  ;;  %v220_v27 = vld [vmem:[%s209_s30] sm:$0x1]  ;;  %s408_s11 = sshll.u32 %s197_s10, 4  ;;  %s640_s28 = scalar_lea.vmem %s639_s27, 32  ;;  %s868_s11 = int_to_ptr.vmem [resolvable:$true] %s408_s11 }
  0x1b   : > { %v221_v28 = vmul.f32 %v220_v27, %v219_v26  ;;  %s634_s23 = scalar_lea.vmem %s868_s11, 16  ;;  %p641_p1 = scmp.lt.s32.totalorder %s868_s11, %s639_s27 }
  0x1c   : > { %p635_p12 = scmp.ne.s32.totalorder %s868_s11, %s634_s23  ;;  %p642_p2 = scmp.lt.s32.totalorder %s640_s28, %s634_s23 }
  0x1d   : > { %555 = vmatpush3.bf16.msra.mxu0 %v554_v13 }
  0x1e   : > { %556 = vmatprep.subr.bf16.mxu0 %v714_v3  ;;  %p636_p13 = pnand %p635_p12, %p778_p4  ;;  %p643_p3 = por %p642_p2, %p641_p1 }
  0x20   : > { %p637_p0 = pneg %p636_p13 }
  0x21   : > { %558 = vmatpush3.bf16.msra.mxu0 %v557_v16 }
  0x22   : > { %559 = vmatprep.subr.bf16.mxu0 %v714_v3  ;;  %p644_p5 = pnand %p643_p3, %p637_p0 }
  0x25   : > { %561 = vmatpush3.bf16.msra.mxu0 %v560_v19 }
  0x26   : > { %562 = vmatprep.subr.bf16.mxu0 %v714_v3 }
  0x29   : > { %564 = vmatpush3.bf16.msra.mxu0 %v563_v22 }
  0x2a   : > { %565 = vmatprep.subr.bf16.mxu0 %v714_v3 }
  0x2d   : > { %567 = vmatpush3.bf16.msra.mxu0 %v566_v25 }
  0x30   : > { %542 = vmatmul.mubr.f32.vlgmr.msra.gmra.mrb[0].mxu0 %v221_v28 }
 0x103   : > { %v304_v30 = vpop.f32.mrb[0].mxu0 }
 0x104   : > { %vm308_vm2 = vcmp.le.f32.partialorder %v304_v30, 0.0  ;;  %v314_v33 = vadd.f32 %v312_v29, %v304_v30  ;;  %v543_v34 = vpop.f32.mrb[1].mxu0 }
 0x105   : > { %v488_v35 = vsel %vm308_vm2, 1.0, %v716_v6  ;;  %v311_v36 = vsel %vm308_vm2, %v304_v30, 0.0 }
 0x106   : > { %316 = vst.msk [vmem:[#allocation2] sm:$0x1] %vm214_vm1, %v314_v33  ;;  %v320_v38 = vadd.f32 %v488_v35, %v318_v31  ;;  %v325_v39 = vadd.f32 %v323_v32, %v311_v36  ;;  %v329_v40 = vmul.f32 %v311_v36, %v311_v36 }
 0x108   : > { %321 = vst.msk [vmem:[#allocation2 + $0x1] sm:$0x1] %vm214_vm1, %v320_v38  ;;  %326 = vst.msk [vmem:[#allocation2 + $0x2] sm:$0x1] %vm214_vm1, %v325_v39  ;;  %v331_v41 = vadd.f32 %v329_v40, %v328_v37 }
 0x10a   : > { %332 = vst.msk [vmem:[#allocation2 + $0x3] sm:$0x1] %vm214_vm1, %v331_v41 }
 0x10d   : > { %v336_v42 = vld [vmem:[#allocation2] sm:$0x1] }
 0x10e   : > { %v337_v43 = vsel %vm214_vm1, %v336_v42, 0.0 }
 0x10f   : > { %338 = vadd.xlane.f32.xlu0 %v337_v43  ;;  %v358_v44 = vld [vmem:[#allocation2 + $0x2] sm:$0x1]  ;;  %v347_v45 = vld [vmem:[#allocation2 + $0x1] sm:$0x1] }
 0x110   : > { %v359_v46 = vsel %vm214_vm1, %v358_v44, 0.0  ;;  %v348_v48 = vsel %vm214_vm1, %v347_v45, 0.0 }
 0x111   : > { %360 = vadd.xlane.f32.xlu1 %v359_v46  ;;  %v369_v47 = vld [vmem:[#allocation2 + $0x3] sm:$0x1] }
 0x112   : > { %v370_v49 = vsel %vm214_vm1, %v369_v47, 0.0 }
 0x113   : > { %349 = vadd.xlane.f32.xlu0 %v348_v48 }
 0x115   : > { %371 = vadd.xlane.f32.xlu1 %v370_v49 }
 0x19c   : > { %v339_v50 = vpop.xlane.xlu0 %338 }
 0x19d   : > { %v340_v51 = vrot.slane %v339_v50, 4 }
 0x19e   : > { %v361_v52 = vpop.xlane.xlu1 %360 }
 0x19f   : > { %v341_v53 = vadd.f32 %v340_v51, %v339_v50  ;;  %v362_v54 = vrot.slane %v361_v52, 4 }
 0x1a0   : > { %v350_v55 = vpop.xlane.xlu0 %349 }
 0x1a1   : > { %v342_v56 = vrot.slane %v341_v53, 2  ;;  %v363_v57 = vadd.f32 %v362_v54, %v361_v52  ;;  %v351_v58 = vrot.slane %v350_v55, 4 }
 0x1a2   : > { %v372_v59 = vpop.xlane.xlu1 %371 }
 0x1a3   : > { %v364_v60 = vrot.slane %v363_v57, 2  ;;  %v352_v61 = vadd.f32 %v351_v58, %v350_v55  ;;  %v373_v62 = vrot.slane %v372_v59, 4  ;;  %v343_v63 = vadd.f32 %v342_v56, %v341_v53 }
 0x1a5   : > { %v353_v0 = vrot.slane %v352_v61, 2  ;;  %v374_v1 = vadd.f32 %v373_v62, %v372_v59  ;;  %v344_v2 = vrot.slane %v343_v63, 1  ;;  %v365_v3 = vadd.f32 %v364_v60, %v363_v57 }
 0x1a7   : > { %v354_v4 = vadd.f32 %v353_v0, %v352_v61  ;;  %v375_v5 = vrot.slane %v374_v1, 2  ;;  %v345_v6 = vadd.f32 %v344_v2, %v343_v63  ;;  %v366_v7 = vrot.slane %v365_v3, 1 }
 0x1a9   : > { %v376_v8 = vadd.f32 %v375_v5, %v374_v1  ;;  %568 = vpush %v345_v6  ;;  %v355_v9 = vrot.slane %v354_v4, 1  ;;  %v367_v12 = vadd.f32 %v366_v7, %v365_v3 }
 0x1ab   : > { %v356_v10 = vadd.f32 %v355_v9, %v354_v4  ;;  %v377_v11 = vrot.slane %v376_v8, 1 }
 0x1ad   : > { %570 = vpush %v356_v10  ;;  %v378_v13 = vadd.f32 %v377_v11, %v376_v8 }
 0x1ae   : > { %572 = vpush %v367_v12 }
 0x1af   : > { %574 = vpush %v378_v13 }
 0x1da   : > { %s569_s5 = spop %568 }
 0x1db   : > { %v392_v21 = vstv %s569_s5 }
 0x1de   : > { %s571_s6 = spop %570 }
 0x1df   : > { %s573_s7 = spop %572  ;;  %v390_v19 = vstv %s571_s6 }
 0x1e0   : > { %s575_s8 = spop %574  ;;  %v388_v17 = vstv %s573_s7 }
 0x1e1   : > { %v386_v16 = vstv %s575_s8 }
 0x1e2   : > { %v387_v18 = vsel %vm385_vm3, %v386_v16, 0.0 }
 0x1e3   : > { %v389_v20 = vsel %vm384_vm4, %v388_v17, %v387_v18 }
 0x1e4   : > { %v391_v22 = vsel %vm383_vm5, %v390_v19, %v389_v20 }
 0x1e5   : > { %v393_v23 = vsel %vm382_vm6, %v392_v21, %v391_v22 }
 0x1e6   : > { %394 = vst [vmem:[%s197_s10] sm:$0x1] %v393_v23 }
 0x1e7   : > { %647 = shalt.err (!%p644_p5)
}
 0x1e8   : > { %s648_s29 = scalar_lea.hbm %s866_s21, 16  ;;  %s652_s5 = scalar_lea.hbm %s916_s3, 32 }
 0x1e9   : > { %p649_p6 = scmp.ne.s32.totalorder %s866_s21, %s648_s29  ;;  %p653_p10 = scmp.lt.u32.totalorder %s866_s21, %s916_s3 }
 0x1ea   : > { %p654_p11 = scmp.lt.u32.totalorder %s652_s5, %s648_s29  ;;  %p656_p13 = scmp.lt.u32.totalorder %s648_s29, %s866_s21 }
 0x1eb   : > { %p650_p7 = pnand %p649_p6, %p778_p4 }
 0x1ec   : > { %p655_p12 = por %p654_p11, %p653_p10 }
 0x1ed   : > { %p651_p9 = pneg %p650_p7 }
 0x1ee   : > { %p657_p0 = por %p656_p13, %p655_p12 }
 0x1f0   : > { %p658_p1 = pnand %p657_p0, %p651_p9 }
 0x1f2   : > { %661 = shalt.err (!%p658_p1)
}
 0x1f3   : > { %576 = dma.vmem_to_hbm [thread:$0]  (%p778_p4), %s868_s11, 16, %s866_s21, %s396_s15  }
 0x1f4 PF: > { %p582_p2 = scmp.ge.s32.totalorder %s712_s17, 2  ;;  %s420_s8 = sand.u32 1, %s692_s12  }
 0x1f5   : > { %s421_s9 = scalar_lea.sflag [#allocation4], %s420_s8 }
 0x1f6   : > { %p579_p3 = pnand %p582_p2, %p785_p8 }
 0x1f8   : > { %687 = dma.done.wait (!%p579_p3), %s421_s9, 16  }
 0x1f9   : > { %689 = vsyncadd (!%p579_p3), %s421_s9, 4294967280  ;;  %s16_s17 = sadd.s32 1, %s712_s17   ;;  %s919_s12 = smov %s696_s13 }
 0x1fa   : > { %p13_p5 = scmp.ge.s32.totalorder %s16_s17, 4   ;;  %s920_s13 = smov %s700_s14 }
 0x1fb   : > { %s921_s14 = smov %s791_s25  ;;  %s922_s15 = smov %s708_s16 }
 0x1fc   : > { %s923_s16 = smov %s925_s20  ;;  %15 = sbr.rel (!%p13_p5) target bundleno = 4 (0x4), region = 81 }
 0x203   :  { %425 = vsyncpa [#allocation4], 1 }
 0x204   :  { %427 = vsyncpa [#allocation4 + $0x1], 1 }

</bundles_post_ra>
